<compile_context>
chip_gen: v7x
topology: tpu7x:2x2x1
jax: 0.10.0
libtpu: 0.0.40
codegen_flags: <defaults>
</compile_context>

<pallas_src>
import functools

import jax
import jax.numpy as jnp
from jax import lax
from jax.experimental import pallas as pl
from jax.experimental.pallas import tpu as pltpu

EPS = 1e-5
LANE = 128


# ---------------------------------------------------------------------------
# Small config helpers
# ---------------------------------------------------------------------------

def _round_up(x, m):
    return (x + m - 1) // m * m


def _vmem_limit_bytes():
    cap = 128 * 1024 * 1024
    try:  # v7x has only 64 MiB per TensorCore; derive instead of hardcoding.
        cap = int(pltpu.get_tpu_info().vmem_capacity_bytes)
    except Exception:
        pass
    return max(16 * 1024 * 1024, min((cap * 3) // 4, 100 * 1024 * 1024))


def _compiler_params(semantics):
    return pltpu.CompilerParams(dimension_semantics=semantics,
                                vmem_limit_bytes=_vmem_limit_bytes())


def _pick_batch_tile(n, lp, c_max, target_bytes=2 * 1024 * 1024):
    """Largest divisor of n whose (c_max, tb*lp) f32 activation block stays
    around target_bytes (keeps double-buffered blocks well under VMEM)."""
    best = 1
    for d in range(1, n + 1):
        if n % d == 0 and d * lp * c_max * 4 <= target_bytes:
            best = d
    return best


# ---------------------------------------------------------------------------
# Kernels.  Layout inside kernels: (channels on sublanes, flattened padded
# batch*length on lanes).  Each length-Lp lane segment is one batch element;
# positions >= L inside a segment are zero padding.
# ---------------------------------------------------------------------------

def _conv3_taps(z, stk_ref, c, seg_len, valid_len):
    """Stack [z[l-1], z[l], z[l+1]] on sublanes into stk_ref (3c, W).

    Neighbours are built with pltpu.roll along the lane axis (XLU); the conv's
    zero padding at each length-L segment boundary is enforced by masking.
    Requires z to be zero at the length-pad positions (q >= valid_len).
    """
    w = z.shape[1]
    q = lax.broadcasted_iota(jnp.int32, z.shape, 1) % seg_len
    left = jnp.where(q == 0, 0.0, pltpu.roll(z, shift=1, axis=1))
    right = jnp.where(q == valid_len - 1, 0.0, pltpu.roll(z, shift=w - 1, axis=1))
    stk_ref[0:c, :] = left            # tap k=0 -> x[l-1]
    stk_ref[c:2 * c, :] = z           # tap k=1 -> x[l]
    stk_ref[2 * c:3 * c, :] = right   # tap k=2 -> x[l+1]


def _conv1_stats_kernel(x_ref, w_ref, y_ref, sum_ref, sq_ref, stk_ref, *,
                        cin, seg_len, valid_len):
    # Stat outputs are block-index-pinned accumulators (resident across grid).
    @pl.when(pl.program_id(0) == 0)
    def _init():
        sum_ref[...] = jnp.zeros_like(sum_ref)
        sq_ref[...] = jnp.zeros_like(sq_ref)

    x = x_ref[...]                                        # (Cin, W); pads are 0
    _conv3_taps(x, stk_ref, cin, seg_len, valid_len)
    # ONE fused MXU dot, K = 3*Cin, N = lane-dense flattened length axis.
    y = jnp.dot(w_ref[...], stk_ref[...],
                preferred_element_type=jnp.float32)       # (C1, W)
    q = lax.broadcasted_iota(jnp.int32, y.shape, 1) % seg_len
    y = jnp.where(q < valid_len, y, 0.0)                  # keep length-pad at 0
    y_ref[...] = y
    sum_ref[...] += jnp.sum(y, axis=1, keepdims=True)     # per-channel BN sums
    sq_ref[...] += jnp.sum(y * y, axis=1, keepdims=True)


def _bn1_conv2_stats_kernel(y1_ref, sc_ref, sh_ref, w_ref, y2_ref, sum_ref,
                            sq_ref, stk_ref, *, c1, seg_len, valid_len):
    @pl.when(pl.program_id(0) == 0)
    def _init():
        sum_ref[...] = jnp.zeros_like(sum_ref)
        sq_ref[...] = jnp.zeros_like(sq_ref)

    y1 = y1_ref[...]                                      # (C1, W)
    q = lax.broadcasted_iota(jnp.int32, y1.shape, 1) % seg_len
    # Folded BN1 affine + ReLU; re-zero the length-pad so it acts as conv2's
    # zero padding (relu(shift) would otherwise leak into the taps).
    h = jnp.maximum(y1 * sc_ref[...] + sh_ref[...], 0.0)
    h = jnp.where(q < valid_len, h, 0.0)
    _conv3_taps(h, stk_ref, c1, seg_len, valid_len)
    y2 = jnp.dot(w_ref[...], stk_ref[...],
                 preferred_element_type=jnp.float32)      # (C2, W), one dot
    q2 = lax.broadcasted_iota(jnp.int32, y2.shape, 1) % seg_len
    y2 = jnp.where(q2 < valid_len, y2, 0.0)
    y2_ref[...] = y2
    sum_ref[...] += jnp.sum(y2, axis=1, keepdims=True)
    sq_ref[...] += jnp.sum(y2 * y2, axis=1, keepdims=True)


def _bn_relu_kernel(y2_ref, sc_ref, sh_ref, o_ref):
    # Folded BN2 affine + ReLU, written in place over y2 (aliased).
    o_ref[...] = jnp.maximum(y2_ref[...] * sc_ref[...] + sh_ref[...], 0.0)


# ---------------------------------------------------------------------------
# Wrapper
# ---------------------------------------------------------------------------

def _fold_bn(total_sum, total_sq, count, gamma, beta):
    """Fold batch-stats BN + affine into a single per-channel scale/shift."""
    mean = total_sum / count
    # Clamp guards the E[x^2]-E[x]^2 cancellation corner case (review note).
    var = jnp.maximum(total_sq / count - mean * mean, 0.0)
    scale = gamma * lax.rsqrt(var + EPS)
    shift = beta - mean * scale
    return scale.reshape(-1, 1), shift.reshape(-1, 1)


def double_conv_pallas(x_ncl, params):
    """x_ncl: (N, Cin, L) float32, PyTorch layout. Returns (N, Cout, L)."""
    w1, b1, g1, be1, w2, b2, g2, be2 = params
    del b1, b2  # exactly cancelled by training-mode BN mean subtraction

    n, cin, length = x_ncl.shape
    c1 = w1.shape[0]
    c2 = w2.shape[0]

    lp = _round_up(length, LANE)            # lane-dense padded per-sample length
    tb = _pick_batch_tile(n, lp, max(cin, c1, c2))
    grid = (n // tb,)
    wblk = tb * lp                          # block lane width (multiple of 128)
    wtot = n * lp

    # Layout plumbing: (N, C, L) -> (C, N, L) -> zero-pad L to Lp -> (C, N*Lp).
    x2 = jnp.pad(jnp.transpose(x_ncl, (1, 0, 2)),
                 ((0, 0), (0, 0), (0, lp - length))).reshape(cin, wtot)
    # Taps stacked as rows (k*Cin + ci): w_cat[co, k*Cin + ci] = w[co, ci, k].
    w1_cat = jnp.transpose(w1, (0, 2, 1)).reshape(c1, 3 * cin)
    w2_cat = jnp.transpose(w2, (0, 2, 1)).reshape(c2, 3 * c1)

    # Passes 1-2 accumulate BN stats across the grid -> reduction semantics.
    cp_red = _compiler_params(("arbitrary",))
    cp_par = _compiler_params(("parallel",))

    # ---- pass 1: conv1 (one fused dot) + BN1 stats in resident accumulators ---
    y1, s1, q1 = pl.pallas_call(
        functools.partial(_conv1_stats_kernel, cin=cin, seg_len=lp,
                          valid_len=length),
        grid=grid,
        in_specs=[pl.BlockSpec((cin, wblk), lambda g: (0, g)),
                  pl.BlockSpec((c1, 3 * cin), lambda g: (0, 0))],
        out_specs=(pl.BlockSpec((c1, wblk), lambda g: (0, g)),
                   pl.BlockSpec((c1, 1), lambda g: (0, 0)),
                   pl.BlockSpec((c1, 1), lambda g: (0, 0))),
        out_shape=(jax.ShapeDtypeStruct((c1, wtot), jnp.float32),
                   jax.ShapeDtypeStruct((c1, 1), jnp.float32),
                   jax.ShapeDtypeStruct((c1, 1), jnp.float32)),
        scratch_shapes=[pltpu.VMEM((3 * cin, wblk), jnp.float32)],
        compiler_params=cp_red,
    )(x2, w1_cat)

    count = float(n * length)
    sc1, sh1 = _fold_bn(s1[:, 0], q1[:, 0], count, g1, be1)     # (C1, 1) each

    # ---- pass 2: folded BN1 + ReLU + conv2 (one fused dot) + BN2 stats ---------
    y2, s2, q2 = pl.pallas_call(
        functools.partial(_bn1_conv2_stats_kernel, c1=c1, seg_len=lp,
                          valid_len=length),
        grid=grid,
        in_specs=[pl.BlockSpec((c1, wblk), lambda g: (0, g)),
                  pl.BlockSpec((c1, 1), lambda g: (0, 0)),
                  pl.BlockSpec((c1, 1), lambda g: (0, 0)),
                  pl.BlockSpec((c2, 3 * c1), lambda g: (0, 0))],
        out_specs=(pl.BlockSpec((c2, wblk), lambda g: (0, g)),
                   pl.BlockSpec((c2, 1), lambda g: (0, 0)),
                   pl.BlockSpec((c2, 1), lambda g: (0, 0))),
        out_shape=(jax.ShapeDtypeStruct((c2, wtot), jnp.float32),
                   jax.ShapeDtypeStruct((c2, 1), jnp.float32),
                   jax.ShapeDtypeStruct((c2, 1), jnp.float32)),
        scratch_shapes=[pltpu.VMEM((3 * c1, wblk), jnp.float32)],
        compiler_params=cp_red,
    )(y1, sc1, sh1, w2_cat)

    sc2, sh2 = _fold_bn(s2[:, 0], q2[:, 0], count, g2, be2)

    # ---- pass 3: folded BN2 + ReLU, written in place over y2 -------------------
    out2 = pl.pallas_call(
        _bn_relu_kernel,
        grid=grid,
        in_specs=[pl.BlockSpec((c2, wblk), lambda g: (0, g)),
                  pl.BlockSpec((c2, 1), lambda g: (0, 0)),
                  pl.BlockSpec((c2, 1), lambda g: (0, 0))],
        out_specs=pl.BlockSpec((c2, wblk), lambda g: (0, g)),
        out_shape=jax.ShapeDtypeStruct((c2, wtot), jnp.float32),
        input_output_aliases={0: 0},
        compiler_params=cp_par,
    )(y2, sc2, sh2)

    # (C2, N*Lp) -> (N, C2, L), dropping the length padding.
    return jnp.transpose(out2.reshape(c2, n, lp)[:, :, :length], (1, 0, 2))


# ---------------------------------------------------------------------------
# Pure-JAX reference (PyTorch double_conv forward, training-mode BN, with biases)
# ---------------------------------------------------------------------------

def double_conv_ref(x_ncl, params):
    w1, b1, g1, be1, w2, b2, g2, be2 = params

    def conv(x, w, b):
        y = lax.conv_general_dilated(x, w, window_strides=(1,), padding=((1, 1),),
                                     dimension_numbers=('NCH', 'OIH', 'NCH'))
        return y + b[None, :, None]

    def bn_relu(y, g, be):
        mean = jnp.mean(y, axis=(0, 2), keepdims=True)
        var = jnp.mean((y - mean) ** 2, axis=(0, 2), keepdims=True)
        yh = (y - mean) / jnp.sqrt(var + EPS)
        return jnp.maximum(yh * g[None, :, None] + be[None, :, None], 0.0)

    h = bn_relu(conv(x_ncl, w1, b1), g1, be1)
    return bn_relu(conv(h, w2, b2), g2, be2)


def make_params(key, in_ch, out_ch):
    ks = jax.random.split(key, 8)
    w1 = 0.2 * jax.random.normal(ks[0], (out_ch, in_ch, 3), jnp.float32)
    b1 = 0.1 * jax.random.normal(ks[1], (out_ch,), jnp.float32)
    g1 = 1.0 + 0.1 * jax.random.normal(ks[2], (out_ch,), jnp.float32)
    be1 = 0.1 * jax.random.normal(ks[3], (out_ch,), jnp.float32)
    w2 = 0.2 * jax.random.normal(ks[4], (out_ch, out_ch, 3), jnp.float32)
    b2 = 0.1 * jax.random.normal(ks[5], (out_ch,), jnp.float32)
    g2 = 1.0 + 0.1 * jax.random.normal(ks[6], (out_ch,), jnp.float32)
    be2 = 0.1 * jax.random.normal(ks[7], (out_ch,), jnp.float32)
    return (w1, b1, g1, be1, w2, b2, g2, be2)


if __name__ == "__main__":
    key = jax.random.PRNGKey(0)
    k_x, k_p = jax.random.split(key)

    N, IN_CH, OUT_CH, L = 2, 4, 8, 16
    x = jax.random.normal(k_x, (N, IN_CH, L), jnp.float32)   # PyTorch (N, C, L)
    params = make_params(k_p, IN_CH, OUT_CH)

    fwd = jax.jit(double_conv_pallas)
    out = jax.block_until_ready(fwd(x, params))
    ref = jax.block_until_ready(double_conv_ref(x, params))

    assert out.shape == (N, OUT_CH, L)
    max_err = float(jnp.max(jnp.abs(out - ref)))
    assert max_err < 2e-3, f"max abs err = {max_err}"
    print("KERNEL_OK")
</pallas_src>

<mosaic_0001>
module attributes {stable_mosaic.version = 11 : i64} {
  func.func @_conv1_stats_kernel(%arg0: i32, %arg1: memref<4x256xf32, #tpu.memory_space<vmem>>, %arg2: memref<8x12xf32, #tpu.memory_space<vmem>>, %arg3: memref<8x256xf32, #tpu.memory_space<vmem>>, %arg4: memref<8x1xf32, #tpu.memory_space<vmem>>, %arg5: memref<8x1xf32, #tpu.memory_space<vmem>>, %arg6: memref<12x256xf32, #tpu.memory_space<vmem>>) attributes {dimension_semantics = [#tpu.dimension_semantics<arbitrary>], iteration_bounds = array<i64: 1>, scalar_prefetch = 0 : i64, scratch_operands = 1 : i64, tpu.core_type = #tpu.core_type<tc>, window_params = [{transform_indices = @transform_0, window_bounds = array<i64: 4, 256>}, {pipeline_mode = #tpu.pipeline_mode<synchronous>, transform_indices = @transform_1, window_bounds = array<i64: 8, 12>}, {transform_indices = @transform_2, window_bounds = array<i64: 8, 256>}, {pipeline_mode = #tpu.pipeline_mode<synchronous>, transform_indices = @transform_3, window_bounds = array<i64: 8, 1>}, {pipeline_mode = #tpu.pipeline_mode<synchronous>, transform_indices = @transform_4, window_bounds = array<i64: 8, 1>}]} {
    %c0_i32 = arith.constant 0 : i32
    %0 = arith.cmpi eq, %arg0, %c0_i32 : i32
    %1 = arith.extui %0 : i1 to i32
    %c0_i32_0 = arith.constant 0 : i32
    %2 = arith.cmpi ne, %1, %c0_i32_0 : i32
    scf.if %2 {
      %cst_37 = arith.constant 0.000000e+00 : f32
      %70 = vector.broadcast %cst_37 : f32 to vector<8x1xf32>
      %c0_38 = arith.constant 0 : index
      %c0_39 = arith.constant 0 : index
      %71 = vector.load %arg4[%c0_38, %c0_39] : memref<8x1xf32, #tpu.memory_space<vmem>>, vector<8x1xf32>
      tpu.vector_store %arg4[%c0_38, %c0_39], %70 {strides = array<i32>} : memref<8x1xf32, #tpu.memory_space<vmem>>, vector<8x1xf32>,
      %cst_40 = arith.constant 0.000000e+00 : f32
      %72 = vector.broadcast %cst_40 : f32 to vector<8x1xf32>
      %c0_41 = arith.constant 0 : index
      %c0_42 = arith.constant 0 : index
      %73 = vector.load %arg5[%c0_41, %c0_42] : memref<8x1xf32, #tpu.memory_space<vmem>>, vector<8x1xf32>
      tpu.vector_store %arg5[%c0_41, %c0_42], %72 {strides = array<i32>} : memref<8x1xf32, #tpu.memory_space<vmem>>, vector<8x1xf32>,
    } else {
    }
    %c0 = arith.constant 0 : index
    %c0_1 = arith.constant 0 : index
    %3 = vector.load %arg1[%c0, %c0_1] : memref<4x256xf32, #tpu.memory_space<vmem>>, vector<4x256xf32>
    %4 = tpu.iota {dimensions = array<i32: 1>} : vector<4x256xi32>
    %c128_i32 = arith.constant 128 : i32
    %c0_i32_2 = arith.constant 0 : i32
    %5 = arith.cmpi eq, %c128_i32, %c0_i32_2 : i32
    %c1_i32 = arith.constant 1 : i32
    %6 = arith.select %5, %c1_i32, %c128_i32 : i32
    %7 = vector.broadcast %6 : i32 to vector<4x256xi32>
    %8 = arith.remsi %4, %7 : vector<4x256xi32>
    %c0_i32_3 = arith.constant 0 : i32
    %9 = vector.broadcast %c0_i32_3 : i32 to vector<4x256xi32>
    %10 = arith.cmpi ne, %8, %9 : vector<4x256xi32>
    %c0_i32_4 = arith.constant 0 : i32
    %11 = vector.broadcast %c0_i32_4 : i32 to vector<4x256xi32>
    %12 = arith.cmpi slt, %8, %11 : vector<4x256xi32>
    %c0_i32_5 = arith.constant 0 : i32
    %13 = arith.cmpi slt, %6, %c0_i32_5 : i32
    %14 = vector.broadcast %13 : i1 to vector<4x256xi1>
    %15 = vector.broadcast %14 : vector<4x256xi1> to vector<4x256xi1>
    %16 = arith.xori %12, %15 : vector<4x256xi1>
    %17 = arith.andi %16, %10 : vector<4x256xi1>
    %18 = vector.broadcast %6 : i32 to vector<4x256xi32>
    %19 = arith.addi %8, %18 : vector<4x256xi32>
    %20 = arith.select %17, %19, %8 : vector<4x256xi1>, vector<4x256xi32>
    %c0_i32_6 = arith.constant 0 : i32
    %21 = vector.broadcast %c0_i32_6 : i32 to vector<4x256xi32>
    %22 = arith.cmpi eq, %20, %21 : vector<4x256xi32>
    %c1_i32_7 = arith.constant 1 : i32
    %23 = tpu.dynamic_rotate %3 by %c1_i32_7 dim 1 : vector<4x256xf32>, i32 -> vector<4x256xf32>
    %cst = arith.constant 0.000000e+00 : f32
    %24 = vector.broadcast %cst : f32 to vector<4x256xf32>
    %25 = arith.select %22, %24, %23 : vector<4x256xi1>, vector<4x256xf32>
    %c15_i32 = arith.constant 15 : i32
    %26 = vector.broadcast %c15_i32 : i32 to vector<4x256xi32>
    %27 = arith.cmpi eq, %20, %26 : vector<4x256xi32>
    %c255_i32 = arith.constant 255 : i32
    %28 = tpu.dynamic_rotate %3 by %c255_i32 dim 1 : vector<4x256xf32>, i32 -> vector<4x256xf32>
    %cst_8 = arith.constant 0.000000e+00 : f32
    %29 = vector.broadcast %cst_8 : f32 to vector<4x256xf32>
    %30 = arith.select %27, %29, %28 : vector<4x256xi1>, vector<4x256xf32>
    %c0_9 = arith.constant 0 : index
    %c0_10 = arith.constant 0 : index
    %31 = vector.load %arg6[%c0_9, %c0_10] : memref<12x256xf32, #tpu.memory_space<vmem>>, vector<4x256xf32>
    tpu.vector_store %arg6[%c0_9, %c0_10], %25 {strides = array<i32>} : memref<12x256xf32, #tpu.memory_space<vmem>>, vector<4x256xf32>,
    %c4 = arith.constant 4 : index
    %c0_11 = arith.constant 0 : index
    %32 = vector.load %arg6[%c4, %c0_11] : memref<12x256xf32, #tpu.memory_space<vmem>>, vector<4x256xf32>
    tpu.vector_store %arg6[%c4, %c0_11], %3 {strides = array<i32>} : memref<12x256xf32, #tpu.memory_space<vmem>>, vector<4x256xf32>,
    %c8 = arith.constant 8 : index
    %c0_12 = arith.constant 0 : index
    %33 = vector.load %arg6[%c8, %c0_12] : memref<12x256xf32, #tpu.memory_space<vmem>>, vector<4x256xf32>
    tpu.vector_store %arg6[%c8, %c0_12], %30 {strides = array<i32>} : memref<12x256xf32, #tpu.memory_space<vmem>>, vector<4x256xf32>,
    %c0_13 = arith.constant 0 : index
    %c0_14 = arith.constant 0 : index
    %34 = vector.load %arg2[%c0_13, %c0_14] : memref<8x12xf32, #tpu.memory_space<vmem>>, vector<8x12xf32>
    %c0_15 = arith.constant 0 : index
    %c0_16 = arith.constant 0 : index
    %35 = vector.load %arg6[%c0_15, %c0_16] : memref<12x256xf32, #tpu.memory_space<vmem>>, vector<12x256xf32>
    %cst_17 = arith.constant dense<0.000000e+00> : vector<8x256xf32>
    %36 = tpu.matmul %34, %35, %cst_17 {dimension_numbers = #tpu.dot_dimension_numbers<[1], [0], [0], [1], [0, 0, 1, 1], [], []>} : vector<8x12xf32>, vector<12x256xf32>, vector<8x256xf32> -> vector<8x256xf32>
    %37 = tpu.iota {dimensions = array<i32: 1>} : vector<8x256xi32>
    %c128_i32_18 = arith.constant 128 : i32
    %c0_i32_19 = arith.constant 0 : i32
    %38 = arith.cmpi eq, %c128_i32_18, %c0_i32_19 : i32
    %c1_i32_20 = arith.constant 1 : i32
    %39 = arith.select %38, %c1_i32_20, %c128_i32_18 : i32
    %40 = vector.broadcast %39 : i32 to vector<8x256xi32>
    %41 = arith.remsi %37, %40 : vector<8x256xi32>
    %c0_i32_21 = arith.constant 0 : i32
    %42 = vector.broadcast %c0_i32_21 : i32 to vector<8x256xi32>
    %43 = arith.cmpi ne, %41, %42 : vector<8x256xi32>
    %c0_i32_22 = arith.constant 0 : i32
    %44 = vector.broadcast %c0_i32_22 : i32 to vector<8x256xi32>
    %45 = arith.cmpi slt, %41, %44 : vector<8x256xi32>
    %c0_i32_23 = arith.constant 0 : i32
    %46 = arith.cmpi slt, %39, %c0_i32_23 : i32
    %47 = vector.broadcast %46 : i1 to vector<8x256xi1>
    %48 = vector.broadcast %47 : vector<8x256xi1> to vector<8x256xi1>
    %49 = arith.xori %45, %48 : vector<8x256xi1>
    %50 = arith.andi %49, %43 : vector<8x256xi1>
    %51 = vector.broadcast %39 : i32 to vector<8x256xi32>
    %52 = arith.addi %41, %51 : vector<8x256xi32>
    %53 = arith.select %50, %52, %41 : vector<8x256xi1>, vector<8x256xi32>
    %c16_i32 = arith.constant 16 : i32
    %54 = vector.broadcast %c16_i32 : i32 to vector<8x256xi32>
    %55 = arith.cmpi slt, %53, %54 : vector<8x256xi32>
    %cst_24 = arith.constant 0.000000e+00 : f32
    %56 = vector.broadcast %cst_24 : f32 to vector<8x256xf32>
    %57 = arith.select %55, %36, %56 : vector<8x256xi1>, vector<8x256xf32>
    %c0_25 = arith.constant 0 : index
    %c0_26 = arith.constant 0 : index
    %58 = vector.load %arg3[%c0_25, %c0_26] : memref<8x256xf32, #tpu.memory_space<vmem>>, vector<8x256xf32>
    tpu.vector_store %arg3[%c0_25, %c0_26], %57 {strides = array<i32>} : memref<8x256xf32, #tpu.memory_space<vmem>>, vector<8x256xf32>,
    %c0_27 = arith.constant 0 : index
    %c0_28 = arith.constant 0 : index
    %59 = vector.load %arg4[%c0_27, %c0_28] : memref<8x1xf32, #tpu.memory_space<vmem>>, vector<8x1xf32>
    %cst_29 = arith.constant dense<0.000000e+00> : vector<8xf32>
    %60 = vector.multi_reduction <add>, %57, %cst_29 [1] : vector<8x256xf32> to vector<8xf32>
    %61 = vector.shape_cast %60 : vector<8xf32> to vector<8x1xf32>
    %62 = arith.addf %59, %61 : vector<8x1xf32>
    %c0_30 = arith.constant 0 : index
    %c0_31 = arith.constant 0 : index
    %63 = vector.load %arg4[%c0_30, %c0_31] : memref<8x1xf32, #tpu.memory_space<vmem>>, vector<8x1xf32>
    tpu.vector_store %arg4[%c0_30, %c0_31], %62 {strides = array<i32>} : memref<8x1xf32, #tpu.memory_space<vmem>>, vector<8x1xf32>,
    %c0_32 = arith.constant 0 : index
    %c0_33 = arith.constant 0 : index
    %64 = vector.load %arg5[%c0_32, %c0_33] : memref<8x1xf32, #tpu.memory_space<vmem>>, vector<8x1xf32>
    %65 = arith.mulf %57, %57 : vector<8x256xf32>
    %cst_34 = arith.constant dense<0.000000e+00> : vector<8xf32>
    %66 = vector.multi_reduction <add>, %65, %cst_34 [1] : vector<8x256xf32> to vector<8xf32>
    %67 = vector.shape_cast %66 : vector<8xf32> to vector<8x1xf32>
    %68 = arith.addf %64, %67 : vector<8x1xf32>
    %c0_35 = arith.constant 0 : index
    %c0_36 = arith.constant 0 : index
    %69 = vector.load %arg5[%c0_35, %c0_36] : memref<8x1xf32, #tpu.memory_space<vmem>>, vector<8x1xf32>
    tpu.vector_store %arg5[%c0_35, %c0_36], %68 {strides = array<i32>} : memref<8x1xf32, #tpu.memory_space<vmem>>, vector<8x1xf32>,
    return
  }
  func.func @transform_0(%arg0: i32) -> (i32, i32) {
    %c0_i32 = arith.constant 0 : i32
    %c0_i32_0 = arith.constant 0 : i32
    return %c0_i32, %arg0 : i32, i32
  }
  func.func @transform_1(%arg0: i32) -> (i32, i32) {
    %c0_i32 = arith.constant 0 : i32
    %c0_i32_0 = arith.constant 0 : i32
    %c0_i32_1 = arith.constant 0 : i32
    return %c0_i32, %c0_i32_0 : i32, i32
  }
  func.func @transform_2(%arg0: i32) -> (i32, i32) {
    %c0_i32 = arith.constant 0 : i32
    %c0_i32_0 = arith.constant 0 : i32
    return %c0_i32, %arg0 : i32, i32
  }
  func.func @transform_3(%arg0: i32) -> (i32, i32) {
    %c0_i32 = arith.constant 0 : i32
    %c0_i32_0 = arith.constant 0 : i32
    %c0_i32_1 = arith.constant 0 : i32
    return %c0_i32, %c0_i32_0 : i32, i32
  }
  func.func @transform_4(%arg0: i32) -> (i32, i32) {
    %c0_i32 = arith.constant 0 : i32
    %c0_i32_0 = arith.constant 0 : i32
    %c0_i32_1 = arith.constant 0 : i32
    return %c0_i32, %c0_i32_0 : i32, i32
  }
}

module attributes {stable_mosaic.version = 11 : i64} {
  func.func @_bn_relu_kernel(%arg0: i32, %arg1: memref<8x256xf32, #tpu.memory_space<vmem>>, %arg2: memref<8x1xf32, #tpu.memory_space<vmem>>, %arg3: memref<8x1xf32, #tpu.memory_space<vmem>>, %arg4: memref<8x256xf32, #tpu.memory_space<vmem>>) attributes {dimension_semantics = [#tpu.dimension_semantics<parallel>], iteration_bounds = array<i64: 1>, scalar_prefetch = 0 : i64, scratch_operands = 0 : i64, tpu.core_type = #tpu.core_type<tc>, window_params = [{transform_indices = @transform_0, window_bounds = array<i64: 8, 256>}, {pipeline_mode = #tpu.pipeline_mode<synchronous>, transform_indices = @transform_1, window_bounds = array<i64: 8, 1>}, {pipeline_mode = #tpu.pipeline_mode<synchronous>, transform_indices = @transform_2, window_bounds = array<i64: 8, 1>}, {transform_indices = @transform_3, window_bounds = array<i64: 8, 256>}]} {
    %c0 = arith.constant 0 : index
    %c0_0 = arith.constant 0 : index
    %0 = vector.load %arg1[%c0, %c0_0] : memref<8x256xf32, #tpu.memory_space<vmem>>, vector<8x256xf32>
    %c0_1 = arith.constant 0 : index
    %c0_2 = arith.constant 0 : index
    %1 = vector.load %arg2[%c0_1, %c0_2] : memref<8x1xf32, #tpu.memory_space<vmem>>, vector<8x1xf32>
    %2 = vector.broadcast %1 : vector<8x1xf32> to vector<8x256xf32>
    %3 = arith.mulf %0, %2 : vector<8x256xf32>
    %c0_3 = arith.constant 0 : index
    %c0_4 = arith.constant 0 : index
    %4 = vector.load %arg3[%c0_3, %c0_4] : memref<8x1xf32, #tpu.memory_space<vmem>>, vector<8x1xf32>
    %5 = vector.broadcast %4 : vector<8x1xf32> to vector<8x256xf32>
    %6 = arith.addf %3, %5 : vector<8x256xf32>
    %cst = arith.constant 0.000000e+00 : f32
    %7 = vector.broadcast %cst : f32 to vector<8x256xf32>
    %8 = arith.maximumf %6, %7 : vector<8x256xf32>
    %c0_5 = arith.constant 0 : index
    %c0_6 = arith.constant 0 : index
    %9 = vector.load %arg4[%c0_5, %c0_6] : memref<8x256xf32, #tpu.memory_space<vmem>>, vector<8x256xf32>
    tpu.vector_store %arg4[%c0_5, %c0_6], %8 {strides = array<i32>} : memref<8x256xf32, #tpu.memory_space<vmem>>, vector<8x256xf32>,
    return
  }
  func.func @transform_0(%arg0: i32) -> (i32, i32) {
    %c0_i32 = arith.constant 0 : i32
    %c0_i32_0 = arith.constant 0 : i32
    return %c0_i32, %arg0 : i32, i32
  }
  func.func @transform_1(%arg0: i32) -> (i32, i32) {
    %c0_i32 = arith.constant 0 : i32
    %c0_i32_0 = arith.constant 0 : i32
    %c0_i32_1 = arith.constant 0 : i32
    return %c0_i32, %c0_i32_0 : i32, i32
  }
  func.func @transform_2(%arg0: i32) -> (i32, i32) {
    %c0_i32 = arith.constant 0 : i32
    %c0_i32_0 = arith.constant 0 : i32
    %c0_i32_1 = arith.constant 0 : i32
    return %c0_i32, %c0_i32_0 : i32, i32
  }
  func.func @transform_3(%arg0: i32) -> (i32, i32) {
    %c0_i32 = arith.constant 0 : i32
    %c0_i32_0 = arith.constant 0 : i32
    return %c0_i32, %arg0 : i32, i32
  }
}

module attributes {stable_mosaic.version = 11 : i64} {
  func.func @_bn1_conv2_stats_kernel(%arg0: i32, %arg1: memref<8x256xf32, #tpu.memory_space<vmem>>, %arg2: memref<8x1xf32, #tpu.memory_space<vmem>>, %arg3: memref<8x1xf32, #tpu.memory_space<vmem>>, %arg4: memref<8x24xf32, #tpu.memory_space<vmem>>, %arg5: memref<8x256xf32, #tpu.memory_space<vmem>>, %arg6: memref<8x1xf32, #tpu.memory_space<vmem>>, %arg7: memref<8x1xf32, #tpu.memory_space<vmem>>, %arg8: memref<24x256xf32, #tpu.memory_space<vmem>>) attributes {dimension_semantics = [#tpu.dimension_semantics<arbitrary>], iteration_bounds = array<i64: 1>, scalar_prefetch = 0 : i64, scratch_operands = 1 : i64, tpu.core_type = #tpu.core_type<tc>, window_params = [{transform_indices = @transform_0, window_bounds = array<i64: 8, 256>}, {pipeline_mode = #tpu.pipeline_mode<synchronous>, transform_indices = @transform_1, window_bounds = array<i64: 8, 1>}, {pipeline_mode = #tpu.pipeline_mode<synchronous>, transform_indices = @transform_2, window_bounds = array<i64: 8, 1>}, {pipeline_mode = #tpu.pipeline_mode<synchronous>, transform_indices = @transform_3, window_bounds = array<i64: 8, 24>}, {transform_indices = @transform_4, window_bounds = array<i64: 8, 256>}, {pipeline_mode = #tpu.pipeline_mode<synchronous>, transform_indices = @transform_5, window_bounds = array<i64: 8, 1>}, {pipeline_mode = #tpu.pipeline_mode<synchronous>, transform_indices = @transform_6, window_bounds = array<i64: 8, 1>}]} {
    %c0_i32 = arith.constant 0 : i32
    %0 = arith.cmpi eq, %arg0, %c0_i32 : i32
    %1 = arith.extui %0 : i1 to i32
    %c0_i32_0 = arith.constant 0 : i32
    %2 = arith.cmpi ne, %1, %c0_i32_0 : i32
    scf.if %2 {
      %cst_50 = arith.constant 0.000000e+00 : f32
      %99 = vector.broadcast %cst_50 : f32 to vector<8x1xf32>
      %c0_51 = arith.constant 0 : index
      %c0_52 = arith.constant 0 : index
      %100 = vector.load %arg6[%c0_51, %c0_52] : memref<8x1xf32, #tpu.memory_space<vmem>>, vector<8x1xf32>
      tpu.vector_store %arg6[%c0_51, %c0_52], %99 {strides = array<i32>} : memref<8x1xf32, #tpu.memory_space<vmem>>, vector<8x1xf32>,
      %cst_53 = arith.constant 0.000000e+00 : f32
      %101 = vector.broadcast %cst_53 : f32 to vector<8x1xf32>
      %c0_54 = arith.constant 0 : index
      %c0_55 = arith.constant 0 : index
      %102 = vector.load %arg7[%c0_54, %c0_55] : memref<8x1xf32, #tpu.memory_space<vmem>>, vector<8x1xf32>
      tpu.vector_store %arg7[%c0_54, %c0_55], %101 {strides = array<i32>} : memref<8x1xf32, #tpu.memory_space<vmem>>, vector<8x1xf32>,
    } else {
    }
    %c0 = arith.constant 0 : index
    %c0_1 = arith.constant 0 : index
    %3 = vector.load %arg1[%c0, %c0_1] : memref<8x256xf32, #tpu.memory_space<vmem>>, vector<8x256xf32>
    %4 = tpu.iota {dimensions = array<i32: 1>} : vector<8x256xi32>
    %c128_i32 = arith.constant 128 : i32
    %c0_i32_2 = arith.constant 0 : i32
    %5 = arith.cmpi eq, %c128_i32, %c0_i32_2 : i32
    %c1_i32 = arith.constant 1 : i32
    %6 = arith.select %5, %c1_i32, %c128_i32 : i32
    %7 = vector.broadcast %6 : i32 to vector<8x256xi32>
    %8 = arith.remsi %4, %7 : vector<8x256xi32>
    %c0_i32_3 = arith.constant 0 : i32
    %9 = vector.broadcast %c0_i32_3 : i32 to vector<8x256xi32>
    %10 = arith.cmpi ne, %8, %9 : vector<8x256xi32>
    %c0_i32_4 = arith.constant 0 : i32
    %11 = vector.broadcast %c0_i32_4 : i32 to vector<8x256xi32>
    %12 = arith.cmpi slt, %8, %11 : vector<8x256xi32>
    %c0_i32_5 = arith.constant 0 : i32
    %13 = arith.cmpi slt, %6, %c0_i32_5 : i32
    %14 = vector.broadcast %13 : i1 to vector<8x256xi1>
    %15 = vector.broadcast %14 : vector<8x256xi1> to vector<8x256xi1>
    %16 = arith.xori %12, %15 : vector<8x256xi1>
    %17 = arith.andi %16, %10 : vector<8x256xi1>
    %18 = vector.broadcast %6 : i32 to vector<8x256xi32>
    %19 = arith.addi %8, %18 : vector<8x256xi32>
    %20 = arith.select %17, %19, %8 : vector<8x256xi1>, vector<8x256xi32>
    %c0_6 = arith.constant 0 : index
    %c0_7 = arith.constant 0 : index
    %21 = vector.load %arg2[%c0_6, %c0_7] : memref<8x1xf32, #tpu.memory_space<vmem>>, vector<8x1xf32>
    %22 = vector.broadcast %21 : vector<8x1xf32> to vector<8x256xf32>
    %23 = arith.mulf %3, %22 : vector<8x256xf32>
    %c0_8 = arith.constant 0 : index
    %c0_9 = arith.constant 0 : index
    %24 = vector.load %arg3[%c0_8, %c0_9] : memref<8x1xf32, #tpu.memory_space<vmem>>, vector<8x1xf32>
    %25 = vector.broadcast %24 : vector<8x1xf32> to vector<8x256xf32>
    %26 = arith.addf %23, %25 : vector<8x256xf32>
    %cst = arith.constant 0.000000e+00 : f32
    %27 = vector.broadcast %cst : f32 to vector<8x256xf32>
    %28 = arith.maximumf %26, %27 : vector<8x256xf32>
    %c16_i32 = arith.constant 16 : i32
    %29 = vector.broadcast %c16_i32 : i32 to vector<8x256xi32>
    %30 = arith.cmpi slt, %20, %29 : vector<8x256xi32>
    %cst_10 = arith.constant 0.000000e+00 : f32
    %31 = vector.broadcast %cst_10 : f32 to vector<8x256xf32>
    %32 = arith.select %30, %28, %31 : vector<8x256xi1>, vector<8x256xf32>
    %33 = tpu.iota {dimensions = array<i32: 1>} : vector<8x256xi32>
    %c128_i32_11 = arith.constant 128 : i32
    %c0_i32_12 = arith.constant 0 : i32
    %34 = arith.cmpi eq, %c128_i32_11, %c0_i32_12 : i32
    %c1_i32_13 = arith.constant 1 : i32
    %35 = arith.select %34, %c1_i32_13, %c128_i32_11 : i32
    %36 = vector.broadcast %35 : i32 to vector<8x256xi32>
    %37 = arith.remsi %33, %36 : vector<8x256xi32>
    %c0_i32_14 = arith.constant 0 : i32
    %38 = vector.broadcast %c0_i32_14 : i32 to vector<8x256xi32>
    %39 = arith.cmpi ne, %37, %38 : vector<8x256xi32>
    %c0_i32_15 = arith.constant 0 : i32
    %40 = vector.broadcast %c0_i32_15 : i32 to vector<8x256xi32>
    %41 = arith.cmpi slt, %37, %40 : vector<8x256xi32>
    %c0_i32_16 = arith.constant 0 : i32
    %42 = arith.cmpi slt, %35, %c0_i32_16 : i32
    %43 = vector.broadcast %42 : i1 to vector<8x256xi1>
    %44 = vector.broadcast %43 : vector<8x256xi1> to vector<8x256xi1>
    %45 = arith.xori %41, %44 : vector<8x256xi1>
    %46 = arith.andi %45, %39 : vector<8x256xi1>
    %47 = vector.broadcast %35 : i32 to vector<8x256xi32>
    %48 = arith.addi %37, %47 : vector<8x256xi32>
    %49 = arith.select %46, %48, %37 : vector<8x256xi1>, vector<8x256xi32>
    %c0_i32_17 = arith.constant 0 : i32
    %50 = vector.broadcast %c0_i32_17 : i32 to vector<8x256xi32>
    %51 = arith.cmpi eq, %49, %50 : vector<8x256xi32>
    %c1_i32_18 = arith.constant 1 : i32
    %52 = tpu.dynamic_rotate %32 by %c1_i32_18 dim 1 : vector<8x256xf32>, i32 -> vector<8x256xf32>
    %cst_19 = arith.constant 0.000000e+00 : f32
    %53 = vector.broadcast %cst_19 : f32 to vector<8x256xf32>
    %54 = arith.select %51, %53, %52 : vector<8x256xi1>, vector<8x256xf32>
    %c15_i32 = arith.constant 15 : i32
    %55 = vector.broadcast %c15_i32 : i32 to vector<8x256xi32>
    %56 = arith.cmpi eq, %49, %55 : vector<8x256xi32>
    %c255_i32 = arith.constant 255 : i32
    %57 = tpu.dynamic_rotate %32 by %c255_i32 dim 1 : vector<8x256xf32>, i32 -> vector<8x256xf32>
    %cst_20 = arith.constant 0.000000e+00 : f32
    %58 = vector.broadcast %cst_20 : f32 to vector<8x256xf32>
    %59 = arith.select %56, %58, %57 : vector<8x256xi1>, vector<8x256xf32>
    %c0_21 = arith.constant 0 : index
    %c0_22 = arith.constant 0 : index
    %60 = vector.load %arg8[%c0_21, %c0_22] : memref<24x256xf32, #tpu.memory_space<vmem>>, vector<8x256xf32>
    tpu.vector_store %arg8[%c0_21, %c0_22], %54 {strides = array<i32>} : memref<24x256xf32, #tpu.memory_space<vmem>>, vector<8x256xf32>,
    %c8 = arith.constant 8 : index
    %c0_23 = arith.constant 0 : index
    %61 = vector.load %arg8[%c8, %c0_23] : memref<24x256xf32, #tpu.memory_space<vmem>>, vector<8x256xf32>
    tpu.vector_store %arg8[%c8, %c0_23], %32 {strides = array<i32>} : memref<24x256xf32, #tpu.memory_space<vmem>>, vector<8x256xf32>,
    %c16 = arith.constant 16 : index
    %c0_24 = arith.constant 0 : index
    %62 = vector.load %arg8[%c16, %c0_24] : memref<24x256xf32, #tpu.memory_space<vmem>>, vector<8x256xf32>
    tpu.vector_store %arg8[%c16, %c0_24], %59 {strides = array<i32>} : memref<24x256xf32, #tpu.memory_space<vmem>>, vector<8x256xf32>,
    %c0_25 = arith.constant 0 : index
    %c0_26 = arith.constant 0 : index
    %63 = vector.load %arg4[%c0_25, %c0_26] : memref<8x24xf32, #tpu.memory_space<vmem>>, vector<8x24xf32>
    %c0_27 = arith.constant 0 : index
    %c0_28 = arith.constant 0 : index
    %64 = vector.load %arg8[%c0_27, %c0_28] : memref<24x256xf32, #tpu.memory_space<vmem>>, vector<24x256xf32>
    %cst_29 = arith.constant dense<0.000000e+00> : vector<8x256xf32>
    %65 = tpu.matmul %63, %64, %cst_29 {dimension_numbers = #tpu.dot_dimension_numbers<[1], [0], [0], [1], [0, 0, 1, 1], [], []>} : vector<8x24xf32>, vector<24x256xf32>, vector<8x256xf32> -> vector<8x256xf32>
    %66 = tpu.iota {dimensions = array<i32: 1>} : vector<8x256xi32>
    %c128_i32_30 = arith.constant 128 : i32
    %c0_i32_31 = arith.constant 0 : i32
    %67 = arith.cmpi eq, %c128_i32_30, %c0_i32_31 : i32
    %c1_i32_32 = arith.constant 1 : i32
    %68 = arith.select %67, %c1_i32_32, %c128_i32_30 : i32
    %69 = vector.broadcast %68 : i32 to vector<8x256xi32>
    %70 = arith.remsi %66, %69 : vector<8x256xi32>
    %c0_i32_33 = arith.constant 0 : i32
    %71 = vector.broadcast %c0_i32_33 : i32 to vector<8x256xi32>
    %72 = arith.cmpi ne, %70, %71 : vector<8x256xi32>
    %c0_i32_34 = arith.constant 0 : i32
    %73 = vector.broadcast %c0_i32_34 : i32 to vector<8x256xi32>
    %74 = arith.cmpi slt, %70, %73 : vector<8x256xi32>
    %c0_i32_35 = arith.constant 0 : i32
    %75 = arith.cmpi slt, %68, %c0_i32_35 : i32
    %76 = vector.broadcast %75 : i1 to vector<8x256xi1>
    %77 = vector.broadcast %76 : vector<8x256xi1> to vector<8x256xi1>
    %78 = arith.xori %74, %77 : vector<8x256xi1>
    %79 = arith.andi %78, %72 : vector<8x256xi1>
    %80 = vector.broadcast %68 : i32 to vector<8x256xi32>
    %81 = arith.addi %70, %80 : vector<8x256xi32>
    %82 = arith.select %79, %81, %70 : vector<8x256xi1>, vector<8x256xi32>
    %c16_i32_36 = arith.constant 16 : i32
    %83 = vector.broadcast %c16_i32_36 : i32 to vector<8x256xi32>
    %84 = arith.cmpi slt, %82, %83 : vector<8x256xi32>
    %cst_37 = arith.constant 0.000000e+00 : f32
    %85 = vector.broadcast %cst_37 : f32 to vector<8x256xf32>
    %86 = arith.select %84, %65, %85 : vector<8x256xi1>, vector<8x256xf32>
    %c0_38 = arith.constant 0 : index
    %c0_39 = arith.constant 0 : index
    %87 = vector.load %arg5[%c0_38, %c0_39] : memref<8x256xf32, #tpu.memory_space<vmem>>, vector<8x256xf32>
    tpu.vector_store %arg5[%c0_38, %c0_39], %86 {strides = array<i32>} : memref<8x256xf32, #tpu.memory_space<vmem>>, vector<8x256xf32>,
    %c0_40 = arith.constant 0 : index
    %c0_41 = arith.constant 0 : index
    %88 = vector.load %arg6[%c0_40, %c0_41] : memref<8x1xf32, #tpu.memory_space<vmem>>, vector<8x1xf32>
    %cst_42 = arith.constant dense<0.000000e+00> : vector<8xf32>
    %89 = vector.multi_reduction <add>, %86, %cst_42 [1] : vector<8x256xf32> to vector<8xf32>
    %90 = vector.shape_cast %89 : vector<8xf32> to vector<8x1xf32>
    %91 = arith.addf %88, %90 : vector<8x1xf32>
    %c0_43 = arith.constant 0 : index
    %c0_44 = arith.constant 0 : index
    %92 = vector.load %arg6[%c0_43, %c0_44] : memref<8x1xf32, #tpu.memory_space<vmem>>, vector<8x1xf32>
    tpu.vector_store %arg6[%c0_43, %c0_44], %91 {strides = array<i32>} : memref<8x1xf32, #tpu.memory_space<vmem>>, vector<8x1xf32>,
    %c0_45 = arith.constant 0 : index
    %c0_46 = arith.constant 0 : index
    %93 = vector.load %arg7[%c0_45, %c0_46] : memref<8x1xf32, #tpu.memory_space<vmem>>, vector<8x1xf32>
    %94 = arith.mulf %86, %86 : vector<8x256xf32>
    %cst_47 = arith.constant dense<0.000000e+00> : vector<8xf32>
    %95 = vector.multi_reduction <add>, %94, %cst_47 [1] : vector<8x256xf32> to vector<8xf32>
    %96 = vector.shape_cast %95 : vector<8xf32> to vector<8x1xf32>
    %97 = arith.addf %93, %96 : vector<8x1xf32>
    %c0_48 = arith.constant 0 : index
    %c0_49 = arith.constant 0 : index
    %98 = vector.load %arg7[%c0_48, %c0_49] : memref<8x1xf32, #tpu.memory_space<vmem>>, vector<8x1xf32>
    tpu.vector_store %arg7[%c0_48, %c0_49], %97 {strides = array<i32>} : memref<8x1xf32, #tpu.memory_space<vmem>>, vector<8x1xf32>,
    return
  }
  func.func @transform_0(%arg0: i32) -> (i32, i32) {
    %c0_i32 = arith.constant 0 : i32
    %c0_i32_0 = arith.constant 0 : i32
    return %c0_i32, %arg0 : i32, i32
  }
  func.func @transform_1(%arg0: i32) -> (i32, i32) {
    %c0_i32 = arith.constant 0 : i32
    %c0_i32_0 = arith.constant 0 : i32
    %c0_i32_1 = arith.constant 0 : i32
    return %c0_i32, %c0_i32_0 : i32, i32
  }
  func.func @transform_2(%arg0: i32) -> (i32, i32) {
    %c0_i32 = arith.constant 0 : i32
    %c0_i32_0 = arith.constant 0 : i32
    %c0_i32_1 = arith.constant 0 : i32
    return %c0_i32, %c0_i32_0 : i32, i32
  }
  func.func @transform_3(%arg0: i32) -> (i32, i32) {
    %c0_i32 = arith.constant 0 : i32
    %c0_i32_0 = arith.constant 0 : i32
    %c0_i32_1 = arith.constant 0 : i32
    return %c0_i32, %c0_i32_0 : i32, i32
  }
  func.func @transform_4(%arg0: i32) -> (i32, i32) {
    %c0_i32 = arith.constant 0 : i32
    %c0_i32_0 = arith.constant 0 : i32
    return %c0_i32, %arg0 : i32, i32
  }
  func.func @transform_5(%arg0: i32) -> (i32, i32) {
    %c0_i32 = arith.constant 0 : i32
    %c0_i32_0 = arith.constant 0 : i32
    %c0_i32_1 = arith.constant 0 : i32
    return %c0_i32, %c0_i32_0 : i32, i32
  }
  func.func @transform_6(%arg0: i32) -> (i32, i32) {
    %c0_i32 = arith.constant 0 : i32
    %c0_i32_0 = arith.constant 0 : i32
    %c0_i32_1 = arith.constant 0 : i32
    return %c0_i32, %c0_i32_0 : i32, i32
  }
}

</mosaic_0001>

<bundles_post_ra>
// kernel: double_conv_pallas.5
= control target key start
LH: loop header
LB: loop body
LE: loop exit
PB: predicated region body
PF: predicated region fallthrough
CT: control target
= control target key end

     0   :  { %8 = vsyncpa [#allocation3], 0  ;;  %s261_s0 = inlined_call_operand.hbm [shape: f32[8,256], index: 0, kind: input, shape index: {}, may-alias: {0,3}]   ;;  %s262_s1 = inlined_call_operand.hbm [shape: f32[8,1], index: 1, kind: input, shape index: {}]   ;;  %s263_s2 = inlined_call_operand.hbm [shape: f32[8,1], index: 2, kind: input, shape index: {}]   ;;  %s264_s3 = inlined_call_operand.hbm [shape: f32[8,256], index: 3, kind: output, shape index: {}, may-alias: {0,3}]  }
   0x1   :  { %9 = vsyncpa [#allocation6], 0 }
   0x2   :  { %10 = vsyncpa [#allocation4], 0  ;;  %s188_s12 = smov [#allocation5]   ;;  %s189_s14 = smov [#allocation2]  }
   0x3   :  { %s27_s13 = sshll.u32 %s188_s12, 4  ;;  %s17_s15 = sshll.u32 %s189_s14, 4  ;;  %s28_s13 = int_to_ptr.vmem [resolvable:$true] %s27_s13  ;;  %s18_s15 = int_to_ptr.vmem [resolvable:$true] %s17_s15 }
   0x4   :  { %s94_s18 = scalar_lea.hbm %s262_s1, 128 }
   0x5   :  { %p95_p0 = scmp.ne.s32.totalorder %s262_s1, %s94_s18  ;;  %p98_p1 = scmp.lt.u32.totalorder %s94_s18, %s262_s1 }
   0x7   :  { %p100_p2 = pnand %p98_p1, %p95_p0 }
   0x9   :  { %103 = shalt.err (!%p100_p2)
}
   0xa   :  { %s104_s23 = scalar_lea.vmem %s28_s13, 128  ;;  %p109_p4 = scmp.lt.s32.totalorder %s28_s13, %s28_s13 }
   0xb   :  { %p105_p3 = scmp.ne.s32.totalorder %s28_s13, %s104_s23  ;;  %p110_p5 = scmp.lt.s32.totalorder %s104_s23, %s104_s23 }
   0xd   :  { %p111_p6 = por %p110_p5, %p109_p4 }
   0xf   :  { %p112_p7 = pnand %p111_p6, %p105_p3 }
  0x11   :  { %115 = shalt.err (!%p112_p7)
}
  0x12   :  { %30 = dma.hbm_to_vmem [thread:$0]  %s262_s1, 128, %s28_s13, [#allocation6]  }
  0x13   :  { %s116_s28 = scalar_lea.hbm %s261_s0, 256 }
  0x14   :  { %p117_p8 = scmp.ne.s32.totalorder %s261_s0, %s116_s28  ;;  %p120_p9 = scmp.lt.u32.totalorder %s116_s28, %s261_s0 }
  0x16   :  { %p122_p10 = pnand %p120_p9, %p117_p8 }
  0x18   :  { %125 = shalt.err (!%p122_p10)
}
  0x19   :  { %s126_s6 = scalar_lea.vmem %s18_s15, 256  ;;  %p131_p12 = scmp.lt.s32.totalorder %s18_s15, %s18_s15 }
  0x1a   :  { %p127_p11 = scmp.ne.s32.totalorder %s18_s15, %s126_s6  ;;  %p132_p13 = scmp.lt.s32.totalorder %s126_s6, %s126_s6 }
  0x1c   :  { %p133_p0 = por %p132_p13, %p131_p12 }
  0x1e   :  { %p134_p1 = pnand %p133_p0, %p127_p11 }
  0x20   :  { %137 = shalt.err (!%p134_p1)
}
  0x21   :  { %20 = dma.hbm_to_vmem [thread:$0]  %s261_s0, 256, %s18_s15, [#allocation3]  }
  0x22   :  { %s190_s8 = smov [#allocation7]   ;;  %s138_s12 = scalar_lea.hbm %s263_s2, 128 }
  0x23   :  { %s37_s9 = sshll.u32 %s190_s8, 4  ;;  %p139_p2 = scmp.ne.s32.totalorder %s263_s2, %s138_s12  ;;  %s38_s9 = int_to_ptr.vmem [resolvable:$true] %s37_s9 }
  0x24   :  { %p142_p3 = scmp.lt.u32.totalorder %s138_s12, %s263_s2 }
  0x26   :  { %p144_p4 = pnand %p142_p3, %p139_p2 }
  0x28   :  { %147 = shalt.err (!%p144_p4)
}
  0x29   :  { %s148_s18 = scalar_lea.vmem %s38_s9, 128  ;;  %p153_p6 = scmp.lt.s32.totalorder %s38_s9, %s38_s9 }
  0x2a   :  { %p149_p5 = scmp.ne.s32.totalorder %s38_s9, %s148_s18  ;;  %p154_p7 = scmp.lt.s32.totalorder %s148_s18, %s148_s18 }
  0x2c   :  { %p155_p8 = por %p154_p7, %p153_p6 }
  0x2e   :  { %p156_p9 = pnand %p155_p8, %p149_p5 }
  0x30   :  { %159 = shalt.err (!%p156_p9)
}
  0x31   :  { %40 = dma.hbm_to_vmem [thread:$0]  %s263_s2, 128, %s38_s9, [#allocation6]  }
  0x32   :  { %182 = dma.done.wait [#allocation3], 256  }
  0x33   :  { %183 = vsyncadd [#allocation3], 4294967040 }
  0x34   :  { %184 = dma.done.wait [#allocation6], 256  }
  0x35   :  { %185 = vsyncadd [#allocation6], 4294967040  ;;  %v191_v0 = vmov 0   ;;  %v52_v1 = vld [vmem:[#allocation5] sm:$0xff]  ;;  %v60_v2 = vld [vmem:[#allocation7] sm:$0xff]  ;;  %s192_s19 = smov [#allocation8]  }
  0x36   :  { %93 = vset.pattern.permute.xlu0 %v191_v0  ;;  %v50_v4 = vld [vmem:[#allocation2] sm:$0xff]  ;;  %v51_v5 = vld [vmem:[#allocation2 + $0x8] sm:$0xff]  ;;  %s78_s20 = sshll.u32 %s192_s19, 4  ;;  %s79_s20 = int_to_ptr.vmem [resolvable:$true] %s78_s20 }
  0x37   :  { %55 = vperm.xlu0 %93, %v52_v1   ;;  %s160_s2 = scalar_lea.vmem %s79_s20, 256  ;;  %p165_p11 = scmp.lt.s32.totalorder %s79_s20, %s79_s20 }
  0x38   :  { %p161_p10 = scmp.ne.s32.totalorder %s79_s20, %s160_s2  ;;  %p166_p12 = scmp.lt.s32.totalorder %s160_s2, %s160_s2 }
  0x3a   :  { %p167_p13 = por %p166_p12, %p165_p11 }
  0x3b   :  { %63 = vperm.xlu0 %93, %v60_v2  }
  0x3c   :  { %p168_p0 = pnand %p167_p13, %p161_p10 }
  0xb6   :  { %v56_v3 = vpop.permute.xlu0 %55 }
  0xb7   :  { %v58_v6 = vmul.f32 %v56_v3, %v50_v4  ;;  %v59_v7 = vmul.f32 %v56_v3, %v51_v5 }
  0xba   :  { %v64_v8 = vpop.permute.xlu0 %63 }
  0xbb   :  { %v66_v9 = vadd.f32 %v64_v8, %v58_v6  ;;  %v67_v10 = vadd.f32 %v64_v8, %v59_v7 }
  0xbd   :  { %v68_v11 = vmax.f32 %v66_v9, 0.0  ;;  %v69_v12 = vmax.f32 %v67_v10, 0.0 }
  0xbf   :  { %70 = vst [vmem:[#allocation8] sm:$0xff] %v68_v11  ;;  %71 = vst [vmem:[#allocation8 + $0x8] sm:$0xff] %v69_v12 }
  0xc0   :  { %171 = shalt.err (!%p168_p0)
}
  0xc1   :  { %s172_s23 = scalar_lea.hbm %s264_s3, 256 }
  0xc2   :  { %p173_p1 = scmp.ne.s32.totalorder %s264_s3, %s172_s23  ;;  %p176_p2 = scmp.lt.u32.totalorder %s172_s23, %s264_s3 }
  0xc4   :  { %p178_p3 = pnand %p176_p2, %p173_p1 }
  0xc6   :  { %181 = shalt.err (!%p178_p3)
}
  0xc7   :  { %81 = dma.vmem_to_hbm [thread:$0]  %s79_s20, 256, %s264_s3, [#allocation4]  }
  0xc8   :  { %186 = dma.done.wait [#allocation4], 256  }
  0xc9   :  { %187 = vsyncadd [#allocation4], 4294967040 }
  0xca   :  { %85 = vsyncpa [#allocation3], 1 }
  0xcb   :  { %86 = vsyncpa [#allocation6], 1 }
  0xcc   :  { %87 = vsyncpa [#allocation4], 1 }

// kernel: double_conv_pallas.3
= control target key start
LH: loop header
LB: loop body
LE: loop exit
PB: predicated region body
PF: predicated region fallthrough
CT: control target
= control target key end

     0   :  { %10 = vsyncpa [#allocation4], 0  ;;  %s495_s0 = inlined_call_operand.hbm [shape: f32[4,256], index: 0, kind: input, shape index: {}]   ;;  %s496_s1 = inlined_call_operand.hbm [shape: f32[8,12], index: 1, kind: input, shape index: {}]   ;;  %s497_s2 = inlined_call_operand.hbm [shape: f32[8,256], index: 2, kind: output, shape index: {0}]   ;;  %s498_s3 = inlined_call_operand.hbm [shape: f32[8,1], index: 3, kind: output, shape index: {1}]   ;;  %s499_s4 = inlined_call_operand.hbm [shape: f32[8,1], index: 4, kind: output, shape index: {2}]  }
   0x1   :  { %11 = vsyncpa [#allocation7], 0 }
   0x2   :  { %12 = vsyncpa [#allocation5], 0 }
   0x3   :  { %13 = vsyncpa [#allocation10], 0  ;;  %s397_s15 = smov [#allocation3]   ;;  %s398_s17 = smov [#allocation6]  }
   0x4   :  { %s20_s16 = sshll.u32 %s397_s15, 4  ;;  %s30_s18 = sshll.u32 %s398_s17, 4  ;;  %s21_s16 = int_to_ptr.vmem [resolvable:$true] %s20_s16  ;;  %s31_s18 = int_to_ptr.vmem [resolvable:$true] %s30_s18 }
   0x5   :  { %s279_s21 = scalar_lea.hbm %s495_s0, 128 }
   0x6   :  { %p280_p0 = scmp.ne.s32.totalorder %s495_s0, %s279_s21  ;;  %p283_p1 = scmp.lt.u32.totalorder %s279_s21, %s495_s0 }
   0x8   :  { %p285_p2 = pnand %p283_p1, %p280_p0 }
   0xa   :  { %288 = shalt.err (!%p285_p2)
}
   0xb   :  { %s289_s26 = scalar_lea.vmem %s21_s16, 128  ;;  %p294_p4 = scmp.lt.s32.totalorder %s21_s16, %s21_s16 }
   0xc   :  { %p290_p3 = scmp.ne.s32.totalorder %s21_s16, %s289_s26  ;;  %p295_p5 = scmp.lt.s32.totalorder %s289_s26, %s289_s26 }
   0xe   :  { %p296_p6 = por %p295_p5, %p294_p4 }
  0x10   :  { %p297_p7 = pnand %p296_p6, %p290_p3 }
  0x12   :  { %300 = shalt.err (!%p297_p7)
}
  0x13   :  { %23 = dma.hbm_to_vmem [thread:$0]  %s495_s0, 128, %s21_s16, [#allocation4]  }
  0x14   :  { %s301_s5 = scalar_lea.hbm %s496_s1, 128 }
  0x15   :  { %p302_p8 = scmp.ne.s32.totalorder %s496_s1, %s301_s5  ;;  %p305_p9 = scmp.lt.u32.totalorder %s301_s5, %s496_s1 }
  0x17   :  { %p307_p10 = pnand %p305_p9, %p302_p8 }
  0x19   :  { %310 = shalt.err (!%p307_p10)
}
  0x1a   :  { %s311_s10 = scalar_lea.vmem %s31_s18, 128  ;;  %p316_p12 = scmp.lt.s32.totalorder %s31_s18, %s31_s18 }
  0x1b   :  { %p312_p11 = scmp.ne.s32.totalorder %s31_s18, %s311_s10  ;;  %p317_p13 = scmp.lt.s32.totalorder %s311_s10, %s311_s10 }
  0x1d   :  { %p318_p0 = por %p317_p13, %p316_p12 }
  0x1f   :  { %p319_p1 = pnand %p318_p0, %p312_p11 }
  0x21   :  { %322 = shalt.err (!%p319_p1)
}
  0x22   :  { %33 = dma.hbm_to_vmem [thread:$0]  %s496_s1, 128, %s31_s18, [#allocation7]  }
  0x23   :  { %389 = dma.done.wait [#allocation4], 128  }
  0x24   :  { %390 = vsyncadd [#allocation4], 4294967168 }
  0x25   :  { %391 = dma.done.wait [#allocation7], 128  }
  0x26   :  { %392 = vsyncadd [#allocation7], 4294967168  ;;  %v47_v0 = vld [vmem:[#allocation3] sm:$0xff]  ;;  %s399_s12 = smov 127   ;;  %s400_s13 = smov 1   ;;  %vm44_vm0 = vcmask 7168   ;;  %v48_v4 = vlaneseq }
  0x27   :  { %91 = vrot.lane.b32.xlu1 %v47_v0, %s399_s12  ;;  %v102_v1 = vcombine.low %v47_v0, %v47_v0  ;;  %105 = vst [vmem:[#allocation2 + $0x8] sm:$0xf0] %v47_v0  ;;  %80 = vrot.lane.b32.xlu0 %v47_v0, %s400_s13  ;;  %v78_v2 = vcombine.high %v47_v0, %v47_v0  ;;  %v401_v3 = vmov 0.0   ;;  %vm117_vm7 = vcmask 1043456   ;;  %v108_v26 = vld [vmem:[#allocation6] sm:$0xff]  ;;  %s403_s1 = smov [#allocation8]  }
  0x28   :  { %45 = vst.msk [vmem:[#allocation9] sm:$0xff] %vm44_vm0, %v401_v3  ;;  %46 = vst.msk [vmem:[#allocation11] sm:$0xff] %vm44_vm0, %v401_v3  ;;  %188 = vmatprep.mubr.f32.mxu0 %v401_v3  ;;  %v49_v5 = vand.u32 127, %v48_v4  ;;  %vm402_vm8 = vmmov 1   ;;  %vm113_vm10 = vcmask 97280   ;;  %s222_s14 = sshll.u32 %s403_s1, 4  ;;  %s223_s14 = int_to_ptr.vmem [resolvable:$true] %s222_s14 }
  0x29   :  { %104 = vst [vmem:[#allocation2] sm:$0xf0] %v102_v1  ;;  %vm263_vm9 = vmpackc.low %vm117_vm7, %vm402_vm8  ;;  %s323_s15 = scalar_lea.vmem %s223_s14, 256  ;;  %p328_p3 = scmp.lt.s32.totalorder %s223_s14, %s223_s14 }
  0x2a   :  { %v50_v6 = vadd.s32 128, %v49_v5  ;;  %vm95_vm1 = vcmp.lt.s32.totalorder %v49_v5, 127  ;;  %vm84_vm2 = vcmp.lt.s32.totalorder %v49_v5, 1  ;;  %vm89_vm3 = vcmp.eq.s32.totalorder %v49_v5, 15  ;;  %p324_p2 = scmp.ne.s32.totalorder %s223_s14, %s323_s15  ;;  %p329_p4 = scmp.lt.s32.totalorder %s323_s15, %s323_s15 }
  0x2b   :  { %93 = vrot.lane.b32.xlu1 %v78_v2, %s399_s12  ;;  %82 = vrot.lane.b32.xlu0 %v78_v2, %s400_s13  ;;  %vm75_vm5 = vcmp.eq.s32.totalorder %v49_v5, 0  ;;  %vm195_vm11 = vcmp.lt.s32.totalorder %v49_v5, 16 }
  0x2c   :  { %v62_v7 = vand.u32 127, %v50_v6  ;;  %p330_p5 = por %p329_p4, %p328_p3 }
  0x2e   :  { %vm90_vm4 = vcmp.eq.s32.totalorder %v62_v7, 15  ;;  %vm76_vm6 = vcmp.eq.s32.totalorder %v62_v7, 0  ;;  %vm196_vm12 = vcmp.lt.s32.totalorder %v62_v7, 16  ;;  %p331_p6 = pnand %p330_p5, %p324_p2 }
  0x99   :  { %v92_v8 = vpop.permute.xlu1 %91  ;;  %v81_v9 = vpop.permute.xlu0 %80 }
  0x9d   :  { %v94_v10 = vpop.permute.xlu1 %93  ;;  %v83_v11 = vpop.permute.xlu0 %82 }
  0x9e   :  { %v96_v12 = vsel %vm95_vm1, %v92_v8, %v94_v10  ;;  %v97_v13 = vsel %vm95_vm1, %v94_v10, %v92_v8  ;;  %v85_v14 = vsel %vm84_vm2, %v81_v9, %v83_v11  ;;  %v86_v15 = vsel %vm84_vm2, %v83_v11, %v81_v9 }
  0x9f   :  { %v98_v16 = vsel %vm89_vm3, 0.0, %v96_v12  ;;  %v99_v17 = vsel %vm90_vm4, 0.0, %v97_v13  ;;  %v87_v18 = vsel %vm75_vm5, 0.0, %v86_v15  ;;  %v88_v19 = vsel %vm76_vm6, 0.0, %v85_v14 }
  0xa0   :  { %106 = vst [vmem:[#allocation2 + $0x10] sm:$0xf] %v98_v16  ;;  %107 = vst [vmem:[#allocation2 + $0x18] sm:$0xf] %v99_v17 }
  0xa1   :  { %100 = vst [vmem:[#allocation2] sm:$0xf] %v87_v18  ;;  %101 = vst [vmem:[#allocation2 + $0x8] sm:$0xf] %v88_v19 }
  0xa7   :  { %v112_v21 = vld [vmem:[#allocation2 + $0x18] sm:$0xf]  ;;  %v111_v24 = vld [vmem:[#allocation2 + $0x10] sm:$0xf] }
  0xa8   :  { %v110_v20 = vld [vmem:[#allocation2 + $0x8] sm:$0xff]  ;;  %v109_v22 = vld [vmem:[#allocation2] sm:$0xff] }
  0xa9   :  { %v262_v23 = vpack.c.bf16 %v112_v21, %v110_v20  ;;  %v265_v25 = vpack.c.bf16 %v111_v24, %v109_v22 }
  0xab   :  { %264 = vmatprep.subr.msk.bf16.mxu0 %vm263_vm9, %v262_v23 }
  0xac   :  { %267 = vmatpush1.bf16.msk.msra.mxu0 %vm263_vm9, %v265_v25 }
  0xaf   :  { %261 = vmatmul.mubr.msk.f32.vlgmr.msra.gmra.mrb[0].mxu0 %vm113_vm10, %v108_v26 }
 0x182   :  { %v190_v27 = vpop.f32.mrb[0].mxu0 }
 0x183   :  { %v197_v28 = vsel %vm195_vm11, %v190_v27, 0.0  ;;  %v192_v29 = vpop.f32.mrb[1].mxu0 }
 0x184   :  { %199 = vst [vmem:[#allocation8] sm:$0xff] %v197_v28  ;;  %v209_v30 = vmul.f32 %v197_v28, %v197_v28  ;;  %v198_v31 = vsel %vm196_vm12, %v192_v29, 0.0 }
 0x185   :  { %200 = vst [vmem:[#allocation8 + $0x8] sm:$0xff] %v198_v31  ;;  %v210_v32 = vmul.f32 %v198_v31, %v198_v31  ;;  %v202_v33 = vadd.f32 %v198_v31, %v197_v28 }
 0x187   :  { %203 = vadd.xlane.f32.xlu0 %v202_v33  ;;  %v211_v34 = vadd.f32 %v210_v32, %v209_v30 }
 0x189   :  { %212 = vadd.xlane.f32.xlu1 %v211_v34 }
 0x18a   :  { %334 = shalt.err (!%p331_p6)
}
 0x18b   :  { %s335_s18 = scalar_lea.hbm %s497_s2, 256 }
 0x18c   :  { %p336_p7 = scmp.ne.s32.totalorder %s497_s2, %s335_s18  ;;  %p339_p8 = scmp.lt.u32.totalorder %s335_s18, %s497_s2 }
 0x18e   :  { %p341_p9 = pnand %p339_p8, %p336_p7 }
 0x190   :  { %344 = shalt.err (!%p341_p9)
}
 0x191   :  { %225 = dma.vmem_to_hbm [thread:$0]  %s223_s14, 256, %s497_s2, [#allocation5]   ;;  %v201_v35 = vld [vmem:[#allocation9] sm:$0xff]  ;;  %v208_v37 = vld [vmem:[#allocation11] sm:$0xff] }
 0x192   :  { %s404_s25 = smov [#allocation9]   ;;  %s405_s27 = smov [#allocation11]  }
 0x193   :  { %s232_s26 = sshll.u32 %s404_s25, 4  ;;  %s242_s28 = sshll.u32 %s405_s27, 4  ;;  %s233_s26 = int_to_ptr.vmem [resolvable:$true] %s232_s26  ;;  %s243_s28 = int_to_ptr.vmem [resolvable:$true] %s242_s28 }
 0x194   :  { %s345_s29 = scalar_lea.vmem %s233_s26, 128  ;;  %p350_p11 = scmp.lt.s32.totalorder %s233_s26, %s233_s26 }
 0x195   :  { %p346_p10 = scmp.ne.s32.totalorder %s233_s26, %s345_s29  ;;  %p351_p12 = scmp.lt.s32.totalorder %s345_s29, %s345_s29 }
 0x197   :  { %p352_p13 = por %p351_p12, %p350_p11 }
 0x199   :  { %p353_p0 = pnand %p352_p13, %p346_p10 }
 0x214   :  { %v204_v36 = vpop.xlane.xlu0 %203 }
 0x215   :  { %v205_v38 = vadd.f32 %v204_v36, %v201_v35 }
 0x216   :  { %v213_v39 = vpop.xlane.xlu1 %212 }
 0x217   :  { %207 = vst.msk [vmem:[#allocation9] sm:$0xff] %vm44_vm0, %v205_v38  ;;  %v214_v40 = vadd.f32 %v213_v39, %v208_v37 }
 0x218   :  { %356 = shalt.err (!%p353_p0)
}
 0x219   :  { %s357_s5 = scalar_lea.hbm %s498_s3, 128 }
 0x21a   :  { %p358_p1 = scmp.ne.s32.totalorder %s498_s3, %s357_s5  ;;  %p361_p2 = scmp.lt.u32.totalorder %s357_s5, %s498_s3 }
 0x21c   :  { %p363_p3 = pnand %p361_p2, %p358_p1 }
 0x21e   :  { %366 = shalt.err (!%p363_p3)
}
 0x21f   :  { %235 = dma.vmem_to_hbm [thread:$0]  %s233_s26, 128, %s498_s3, [#allocation10]   ;;  %215 = vst.msk [vmem:[#allocation11] sm:$0xff] %vm44_vm0, %v214_v40 }
 0x220   :  { %s367_s11 = scalar_lea.vmem %s243_s28, 128  ;;  %p372_p5 = scmp.lt.s32.totalorder %s243_s28, %s243_s28 }
 0x221   :  { %p368_p4 = scmp.ne.s32.totalorder %s243_s28, %s367_s11  ;;  %p373_p6 = scmp.lt.s32.totalorder %s367_s11, %s367_s11 }
 0x223   :  { %p374_p7 = por %p373_p6, %p372_p5 }
 0x225   :  { %p375_p8 = pnand %p374_p7, %p368_p4 }
 0x227   :  { %378 = shalt.err (!%p375_p8)
}
 0x228   :  { %s379_s1 = scalar_lea.hbm %s499_s4, 128 }
 0x229   :  { %p380_p9 = scmp.ne.s32.totalorder %s499_s4, %s379_s1  ;;  %p383_p10 = scmp.lt.u32.totalorder %s379_s1, %s499_s4 }
 0x22b   :  { %p385_p11 = pnand %p383_p10, %p380_p9 }
 0x22d   :  { %388 = shalt.err (!%p385_p11)
}
 0x22e   :  { %245 = dma.vmem_to_hbm [thread:$0]  %s243_s28, 128, %s499_s4, [#allocation10]  }
 0x22f   :  { %393 = dma.done.wait [#allocation5], 256  }
 0x230   :  { %394 = vsyncadd [#allocation5], 4294967040 }
 0x231   :  { %395 = dma.done.wait [#allocation10], 256  }
 0x232   :  { %396 = vsyncadd [#allocation10], 4294967040 }
 0x233   :  { %255 = vsyncpa [#allocation4], 1 }
 0x234   :  { %256 = vsyncpa [#allocation7], 1 }
 0x235   :  { %257 = vsyncpa [#allocation5], 1 }
 0x236   :  { %258 = vsyncpa [#allocation10], 1 }

// kernel: double_conv_pallas.4
= control target key start
LH: loop header
LB: loop body
LE: loop exit
PB: predicated region body
PF: predicated region fallthrough
CT: control target
= control target key end

     0   :  { %12 = vsyncpa [#allocation4], 0  ;;  %s642_s0 = inlined_call_operand.hbm [shape: f32[8,256], index: 0, kind: input, shape index: {}]   ;;  %s643_s1 = inlined_call_operand.hbm [shape: f32[8,1], index: 1, kind: input, shape index: {}]   ;;  %s644_s2 = inlined_call_operand.hbm [shape: f32[8,1], index: 2, kind: input, shape index: {}]   ;;  %s645_s3 = inlined_call_operand.hbm [shape: f32[8,24], index: 3, kind: input, shape index: {}]   ;;  %s646_s4 = inlined_call_operand.hbm [shape: f32[8,256], index: 4, kind: output, shape index: {0}]   ;;  %s647_s5 = inlined_call_operand.hbm [shape: f32[8,1], index: 5, kind: output, shape index: {1}]   ;;  %s648_s6 = inlined_call_operand.hbm [shape: f32[8,1], index: 6, kind: output, shape index: {2}]  }
   0x1   :  { %13 = vsyncpa [#allocation7], 0 }
   0x2   :  { %14 = vsyncpa [#allocation10], 0 }
   0x3   :  { %15 = vsyncpa [#allocation5], 0 }
   0x4   :  { %16 = vsyncpa [#allocation13], 0  ;;  %s502_s21 = smov [#allocation6]   ;;  %s503_s23 = smov [#allocation3]  }
   0x5   :  { %s33_s22 = sshll.u32 %s502_s21, 4  ;;  %s23_s24 = sshll.u32 %s503_s23, 4  ;;  %s34_s22 = int_to_ptr.vmem [resolvable:$true] %s33_s22  ;;  %s24_s24 = int_to_ptr.vmem [resolvable:$true] %s23_s24 }
   0x6   :  { %s338_s27 = scalar_lea.hbm %s643_s1, 128 }
   0x7   :  { %p339_p0 = scmp.ne.s32.totalorder %s643_s1, %s338_s27  ;;  %p342_p1 = scmp.lt.u32.totalorder %s338_s27, %s643_s1 }
   0x9   :  { %p344_p2 = pnand %p342_p1, %p339_p0 }
   0xb   :  { %347 = shalt.err (!%p344_p2)
}
   0xc   :  { %s348_s8 = scalar_lea.vmem %s34_s22, 128  ;;  %p353_p4 = scmp.lt.s32.totalorder %s34_s22, %s34_s22 }
   0xd   :  { %p349_p3 = scmp.ne.s32.totalorder %s34_s22, %s348_s8  ;;  %p354_p5 = scmp.lt.s32.totalorder %s348_s8, %s348_s8 }
   0xf   :  { %p355_p6 = por %p354_p5, %p353_p4 }
  0x11   :  { %p356_p7 = pnand %p355_p6, %p349_p3 }
  0x13   :  { %359 = shalt.err (!%p356_p7)
}
  0x14   :  { %36 = dma.hbm_to_vmem [thread:$0]  %s643_s1, 128, %s34_s22, [#allocation7]  }
  0x15   :  { %s360_s13 = scalar_lea.hbm %s642_s0, 256 }
  0x16   :  { %p361_p8 = scmp.ne.s32.totalorder %s642_s0, %s360_s13  ;;  %p364_p9 = scmp.lt.u32.totalorder %s360_s13, %s642_s0 }
  0x18   :  { %p366_p10 = pnand %p364_p9, %p361_p8 }
  0x1a   :  { %369 = shalt.err (!%p366_p10)
}
  0x1b   :  { %s370_s18 = scalar_lea.vmem %s24_s24, 256  ;;  %p375_p12 = scmp.lt.s32.totalorder %s24_s24, %s24_s24 }
  0x1c   :  { %p371_p11 = scmp.ne.s32.totalorder %s24_s24, %s370_s18  ;;  %p376_p13 = scmp.lt.s32.totalorder %s370_s18, %s370_s18 }
  0x1e   :  { %p377_p0 = por %p376_p13, %p375_p12 }
  0x20   :  { %p378_p1 = pnand %p377_p0, %p371_p11 }
  0x22   :  { %381 = shalt.err (!%p378_p1)
}
  0x23   :  { %26 = dma.hbm_to_vmem [thread:$0]  %s642_s0, 256, %s24_s24, [#allocation4]  }
  0x24   :  { %s504_s20 = smov [#allocation8]   ;;  %s505_s22 = smov [#allocation9]  }
  0x25   :  { %s43_s21 = sshll.u32 %s504_s20, 4  ;;  %s53_s23 = sshll.u32 %s505_s22, 4  ;;  %s44_s21 = int_to_ptr.vmem [resolvable:$true] %s43_s21  ;;  %s54_s23 = int_to_ptr.vmem [resolvable:$true] %s53_s23 }
  0x26   :  { %s382_s27 = scalar_lea.hbm %s644_s2, 128 }
  0x27   :  { %p383_p2 = scmp.ne.s32.totalorder %s644_s2, %s382_s27  ;;  %p386_p3 = scmp.lt.u32.totalorder %s382_s27, %s644_s2 }
  0x29   :  { %p388_p4 = pnand %p386_p3, %p383_p2 }
  0x2b   :  { %391 = shalt.err (!%p388_p4)
}
  0x2c   :  { %s392_s0 = scalar_lea.vmem %s44_s21, 128  ;;  %p397_p6 = scmp.lt.s32.totalorder %s44_s21, %s44_s21 }
  0x2d   :  { %p393_p5 = scmp.ne.s32.totalorder %s44_s21, %s392_s0  ;;  %p398_p7 = scmp.lt.s32.totalorder %s392_s0, %s392_s0 }
  0x2f   :  { %p399_p8 = por %p398_p7, %p397_p6 }
  0x31   :  { %p400_p9 = pnand %p399_p8, %p393_p5 }
  0x33   :  { %403 = shalt.err (!%p400_p9)
}
  0x34   :  { %46 = dma.hbm_to_vmem [thread:$0]  %s644_s2, 128, %s44_s21, [#allocation7]  }
  0x35   :  { %s404_s11 = scalar_lea.hbm %s645_s3, 128 }
  0x36   :  { %p405_p10 = scmp.ne.s32.totalorder %s645_s3, %s404_s11  ;;  %p408_p11 = scmp.lt.u32.totalorder %s404_s11, %s645_s3 }
  0x38   :  { %p410_p12 = pnand %p408_p11, %p405_p10 }
  0x3a   :  { %413 = shalt.err (!%p410_p12)
}
  0x3b   :  { %s414_s16 = scalar_lea.vmem %s54_s23, 128  ;;  %p419_p0 = scmp.lt.s32.totalorder %s54_s23, %s54_s23 }
  0x3c   :  { %p415_p13 = scmp.ne.s32.totalorder %s54_s23, %s414_s16  ;;  %p420_p1 = scmp.lt.s32.totalorder %s414_s16, %s414_s16 }
  0x3e   :  { %p421_p2 = por %p420_p1, %p419_p0 }
  0x40   :  { %p422_p3 = pnand %p421_p2, %p415_p13 }
  0x42   :  { %425 = shalt.err (!%p422_p3)
}
  0x43   :  { %56 = dma.hbm_to_vmem [thread:$0]  %s645_s3, 128, %s54_s23, [#allocation10]  }
  0x44   :  { %492 = dma.done.wait [#allocation4], 256  }
  0x45   :  { %493 = vsyncadd [#allocation4], 4294967040 }
  0x46   :  { %494 = dma.done.wait [#allocation7], 256  }
  0x47   :  { %495 = vsyncadd [#allocation7], 4294967040 }
  0x48   :  { %496 = dma.done.wait [#allocation10], 128  }
  0x49   :  { %497 = vsyncadd [#allocation10], 4294967168  ;;  %v506_v0 = vmov 0   ;;  %v105_v1 = vld [vmem:[#allocation6] sm:$0xff]  ;;  %v113_v2 = vld [vmem:[#allocation8] sm:$0xff]  ;;  %v78_v3 = vlaneseq  ;;  %vm73_vm2 = vcmask 7168  }
  0x4a   :  { %332 = vset.pattern.permute.xlu0 %v506_v0  ;;  %v76_v7 = vld [vmem:[#allocation3] sm:$0xff]  ;;  %v77_v8 = vld [vmem:[#allocation3 + $0x8] sm:$0xff]  ;;  %v507_v19 = vmov 0.0   ;;  %s508_s3 = smov 127   ;;  %s509_s18 = smov 1   ;;  %vm162_vm11 = vcmask 195584  }
  0x4b   :  { %108 = vperm.xlu0 %332, %v105_v1   ;;  %v79_v4 = vand.u32 127, %v78_v3  ;;  %230 = vmatprep.mubr.f32.mxu0 %v507_v19  ;;  %74 = vst.msk [vmem:[#allocation12] sm:$0xff] %vm73_vm2, %v507_v19  ;;  %75 = vst.msk [vmem:[#allocation14] sm:$0xff] %vm73_vm2, %v507_v19  ;;  %v155_v31 = vld [vmem:[#allocation9] sm:$0xff]  ;;  %s510_s1 = smov [#allocation11]  }
  0x4c   :  { %s262_s19 = sshll.u32 %s510_s1, 4  ;;  %s263_s19 = int_to_ptr.vmem [resolvable:$true] %s262_s19 }
  0x4d   :  { %v80_v5 = vadd.s32 128, %v79_v4  ;;  %vm123_vm1 = vcmp.lt.s32.totalorder %v79_v4, 16  ;;  %vm133_vm3 = vcmp.lt.s32.totalorder %v79_v4, 1  ;;  %vm318_vm5 = vcmp.ne.s32.totalorder %v79_v4, 0  ;;  %s426_s20 = scalar_lea.vmem %s263_s19, 256  ;;  %p431_p5 = scmp.lt.s32.totalorder %s263_s19, %s263_s19 }
  0x4e   :  { %vm144_vm7 = vcmp.lt.s32.totalorder %v79_v4, 127  ;;  %vm315_vm8 = vmpackc.low %vm123_vm1, %vm318_vm5  ;;  %vm320_vm10 = vcmp.ne.s32.totalorder %v79_v4, 15  ;;  %p427_p4 = scmp.ne.s32.totalorder %s263_s19, %s426_s20  ;;  %p432_p6 = scmp.lt.s32.totalorder %s426_s20, %s426_s20 }
  0x4f   :  { %116 = vperm.xlu0 %332, %v113_v2   ;;  %v92_v9 = vand.u32 127, %v80_v5 }
  0x50   :  { %p433_p7 = por %p432_p6, %p431_p5 }
  0x51   :  { %vm124_vm0 = vcmp.lt.s32.totalorder %v92_v9, 16  ;;  %vm317_vm4 = vcmp.ne.s32.totalorder %v92_v9, 0  ;;  %vm319_vm9 = vcmp.ne.s32.totalorder %v92_v9, 15 }
  0x52   :  { %vm312_vm6 = vmpackc.low %vm124_vm0, %vm317_vm4  ;;  %p434_p8 = pnand %p433_p7, %p427_p4 }
  0xca   :  { %v109_v6 = vpop.permute.xlu0 %108 }
  0xcb   :  { %v111_v10 = vmul.f32 %v109_v6, %v76_v7  ;;  %v112_v11 = vmul.f32 %v109_v6, %v77_v8 }
  0xce   :  { %v117_v12 = vpop.permute.xlu0 %116 }
  0xcf   :  { %v119_v13 = vadd.f32 %v117_v12, %v111_v10  ;;  %v120_v14 = vadd.f32 %v117_v12, %v112_v11 }
  0xd1   :  { %v121_v15 = vmax.f32 %v119_v13, 0.0  ;;  %v122_v16 = vmax.f32 %v120_v14, 0.0 }
  0xd3   :  { %v126_v17 = vsel %vm124_vm0, %v122_v16, 0.0  ;;  %v125_v18 = vsel %vm123_vm1, %v121_v15, 0.0 }
  0xd4   :  { %142 = vrot.lane.b32.xlu0 %v126_v17, %s508_s3  ;;  %v333_v20 = vpack.i.bf16 %v126_v17, %v125_v18 }
  0xd6   :  { %334 = vrot.lane.b32.xlu1 %v333_v20, %s509_s18 }
  0xda   :  { %140 = vrot.lane.b32.xlu1 %v125_v18, %s508_s3 }
 0x146   :  { %v143_v29 = vpop.permute.xlu0 %142 }
 0x148   :  { %v335_v21 = vpop.permute.xlu1 %334 }
 0x149   :  { %v337_v22 = vunpack.i.h.bf16 %v335_v21  ;;  %v336_v23 = vunpack.i.l.bf16 %v335_v21 }
 0x14b   :  { %v134_v24 = vsel %vm133_vm3, %v336_v23, %v337_v22  ;;  %v135_v25 = vsel %vm133_vm3, %v337_v22, %v336_v23 }
 0x14c   :  { %v141_v26 = vpop.permute.xlu1 %140  ;;  %v311_v27 = vpack.c.bf16 %v122_v16, %v134_v24  ;;  %v314_v28 = vpack.c.bf16 %v121_v15, %v135_v25 }
 0x14d   :  { %v146_v30 = vsel %vm144_vm7, %v143_v29, %v141_v26  ;;  %v145_v32 = vsel %vm144_vm7, %v141_v26, %v143_v29 }
 0x14e   :  { %313 = vmatprep.subr.msk.bf16.mxu0 %vm312_vm6, %v311_v27 }
 0x14f   :  { %316 = vmatpush1.bf16.msk.msra.mxu0 %vm315_vm8, %v314_v28 }
 0x150   :  { %308 = vmatprep.subr.msk.mxu0 %vm319_vm9, %v146_v30 }
 0x153   :  { %310 = vmatpush1.msk.msra.mxu0 %vm320_vm10, %v145_v32 }
 0x154   :  { %300 = vmatmul.mubr.msk.f32.vlgmr.msra.gmra.mrb[0].mxu0 %vm162_vm11, %v155_v31 }
 0x227   :  { %v232_v33 = vpop.f32.mrb[0].mxu0 }
 0x228   :  { %v237_v34 = vsel %vm123_vm1, %v232_v33, 0.0  ;;  %v234_v35 = vpop.f32.mrb[1].mxu0 }
 0x229   :  { %239 = vst [vmem:[#allocation11] sm:$0xff] %v237_v34  ;;  %v249_v36 = vmul.f32 %v237_v34, %v237_v34  ;;  %v238_v37 = vsel %vm124_vm0, %v234_v35, 0.0 }
 0x22a   :  { %240 = vst [vmem:[#allocation11 + $0x8] sm:$0xff] %v238_v37  ;;  %v250_v38 = vmul.f32 %v238_v37, %v238_v37  ;;  %v242_v39 = vadd.f32 %v238_v37, %v237_v34 }
 0x22c   :  { %243 = vadd.xlane.f32.xlu1 %v242_v39  ;;  %v251_v40 = vadd.f32 %v250_v38, %v249_v36 }
 0x22e   :  { %252 = vadd.xlane.f32.xlu0 %v251_v40 }
 0x22f   :  { %437 = shalt.err (!%p434_p8)
}
 0x230   :  { %s438_s23 = scalar_lea.hbm %s646_s4, 256 }
 0x231   :  { %p439_p9 = scmp.ne.s32.totalorder %s646_s4, %s438_s23  ;;  %p442_p10 = scmp.lt.u32.totalorder %s438_s23, %s646_s4 }
 0x233   :  { %p444_p11 = pnand %p442_p10, %p439_p9 }
 0x235   :  { %447 = shalt.err (!%p444_p11)
}
 0x236   :  { %265 = dma.vmem_to_hbm [thread:$0]  %s263_s19, 256, %s646_s4, [#allocation5]   ;;  %v241_v41 = vld [vmem:[#allocation12] sm:$0xff]  ;;  %v248_v43 = vld [vmem:[#allocation14] sm:$0xff] }
 0x237   :  { %s511_s7 = smov [#allocation12]   ;;  %s512_s24 = smov [#allocation14]  }
 0x238   :  { %s272_s0 = sshll.u32 %s511_s7, 4  ;;  %s282_s8 = sshll.u32 %s512_s24, 4  ;;  %s273_s0 = int_to_ptr.vmem [resolvable:$true] %s272_s0  ;;  %s283_s8 = int_to_ptr.vmem [resolvable:$true] %s282_s8 }
 0x239   :  { %s448_s9 = scalar_lea.vmem %s273_s0, 128  ;;  %p453_p13 = scmp.lt.s32.totalorder %s273_s0, %s273_s0 }
 0x23a   :  { %p449_p12 = scmp.ne.s32.totalorder %s273_s0, %s448_s9  ;;  %p454_p0 = scmp.lt.s32.totalorder %s448_s9, %s448_s9 }
 0x23c   :  { %p455_p1 = por %p454_p0, %p453_p13 }
 0x23e   :  { %p456_p2 = pnand %p455_p1, %p449_p12 }
 0x2b9   :  { %v244_v42 = vpop.xlane.xlu1 %243 }
 0x2ba   :  { %v245_v44 = vadd.f32 %v244_v42, %v241_v41 }
 0x2bb   :  { %v253_v45 = vpop.xlane.xlu0 %252 }
 0x2bc   :  { %247 = vst.msk [vmem:[#allocation12] sm:$0xff] %vm73_vm2, %v245_v44  ;;  %v254_v46 = vadd.f32 %v253_v45, %v248_v43 }
 0x2bd   :  { %459 = shalt.err (!%p456_p2)
}
 0x2be   :  { %s460_s11 = scalar_lea.hbm %s647_s5, 128 }
 0x2bf   :  { %p461_p3 = scmp.ne.s32.totalorder %s647_s5, %s460_s11  ;;  %p464_p4 = scmp.lt.u32.totalorder %s460_s11, %s647_s5 }
 0x2c1   :  { %p466_p5 = pnand %p464_p4, %p461_p3 }
 0x2c3   :  { %469 = shalt.err (!%p466_p5)
}
 0x2c4   :  { %275 = dma.vmem_to_hbm [thread:$0]  %s273_s0, 128, %s647_s5, [#allocation13]   ;;  %255 = vst.msk [vmem:[#allocation14] sm:$0xff] %vm73_vm2, %v254_v46 }
 0x2c5   :  { %s470_s17 = scalar_lea.vmem %s283_s8, 128  ;;  %p475_p7 = scmp.lt.s32.totalorder %s283_s8, %s283_s8 }
 0x2c6   :  { %p471_p6 = scmp.ne.s32.totalorder %s283_s8, %s470_s17  ;;  %p476_p8 = scmp.lt.s32.totalorder %s470_s17, %s470_s17 }
 0x2c8   :  { %p477_p9 = por %p476_p8, %p475_p7 }
 0x2ca   :  { %p478_p10 = pnand %p477_p9, %p471_p6 }
 0x2cc   :  { %481 = shalt.err (!%p478_p10)
}
 0x2cd   :  { %s482_s1 = scalar_lea.hbm %s648_s6, 128 }
 0x2ce   :  { %p483_p11 = scmp.ne.s32.totalorder %s648_s6, %s482_s1  ;;  %p486_p12 = scmp.lt.u32.totalorder %s482_s1, %s648_s6 }
 0x2d0   :  { %p488_p13 = pnand %p486_p12, %p483_p11 }
 0x2d2   :  { %491 = shalt.err (!%p488_p13)
}
 0x2d3   :  { %285 = dma.vmem_to_hbm [thread:$0]  %s283_s8, 128, %s648_s6, [#allocation13]  }
 0x2d4   :  { %498 = dma.done.wait [#allocation5], 256  }
 0x2d5   :  { %499 = vsyncadd [#allocation5], 4294967040 }
 0x2d6   :  { %500 = dma.done.wait [#allocation13], 256  }
 0x2d7   :  { %501 = vsyncadd [#allocation13], 4294967040 }
 0x2d8   :  { %295 = vsyncpa [#allocation4], 1 }
 0x2d9   :  { %296 = vsyncpa [#allocation7], 1 }
 0x2da   :  { %297 = vsyncpa [#allocation10], 1 }
 0x2db   :  { %298 = vsyncpa [#allocation5], 1 }
 0x2dc   :  { %299 = vsyncpa [#allocation13], 1 }

</bundles_post_ra>
